<compile_context>
chip_gen: v7x
topology: tpu7x:2x2x1
jax: 0.10.0
libtpu: 0.0.40
codegen_flags: <defaults>
</compile_context>

<pallas_src>
import functools

import jax
import jax.numpy as jnp
from jax import lax
from jax.experimental import pallas as pl
from jax.experimental.pallas import tpu as pltpu

_SQRT_HALF = 0.7071067811865476  # 1/sqrt(2)
_MIB = 1024 * 1024


def _round_up(x, m):
    return -(-x // m) * m


def _apply_act(y, act):
    if act == "gelu":
        # torch.nn.GELU() default = exact erf form; epilogue math stays in f32.
        # TODO(synk): on v7x the erf polynomial can become the binding VALU cost once
        # tiles are large; switch to tanh-approximate GELU (EUP slot) only if the
        # model owner allows the approximation.
        return 0.5 * y * (1.0 + lax.erf(y * _SQRT_HALF))
    if act == "relu":
        return jnp.maximum(y, 0.0)
    return y


def _fused_kernel(x_ref, w_ref, b_ref, o_ref, *, act):
    """grid = (M/tm, I/tn); the whole K=H reduction is resident -> no accumulator."""
    y = jnp.dot(x_ref[...], w_ref[...], preferred_element_type=jnp.float32)
    y = y + b_ref[...]                      # bias kept f32 end-to-end
    o_ref[...] = _apply_act(y, act).astype(o_ref.dtype)


def _ksplit_kernel(x_ref, w_ref, b_ref, o_ref, acc_ref, *, act):
    """Fallback for huge H: grid = (M/tm, I/tn, H/tk) with an f32 VMEM accumulator."""
    k = pl.program_id(2)
    prod = jnp.dot(x_ref[...], w_ref[...], preferred_element_type=jnp.float32)

    @pl.when(k == 0)
    def _():
        acc_ref[...] = prod                 # init with the first product (no zero+add)

    @pl.when(k > 0)
    def _():
        acc_ref[...] += prod

    @pl.when(k == pl.num_programs(2) - 1)
    def _():
        y = acc_ref[...] + b_ref[...]
        o_ref[...] = _apply_act(y, act).astype(o_ref.dtype)


def _vmem_budget_bytes():
    """Usable VMEM budget: 75% of physical capacity (v7x-safe fallback if unknown)."""
    try:
        cap = pltpu.get_tpu_info().vmem_capacity_bytes
    except Exception:  # query unavailable -> assume the smallest (v7x 64 MiB / TC)
        cap = 64 * _MIB
    return int(cap * 0.75)


def _select_collapsed_tiles(M, H, I, in_b, out_b, budget):
    """Pick (tm, tn) for the collapsed-K kernel under a VMEM footprint cap."""
    # N (lane) tile: prefer the full intermediate dim (weight fully resident, DMA'd
    # once); otherwise a 128-aligned strip whose double-buffered weight block uses
    # at most half the budget.  Never emit a lane tile < 128 for aligned shapes.
    if I % 128 != 0:
        tn = I                                      # full-dim block is always legal
    else:
        tn = I
        while tn > 128 and 2 * H * tn * in_b > budget // 2:
            tn = max(128, _round_up(tn // 2, 128))

    def footprint(tm):
        return (2 * tm * H * in_b                   # x blocks (double-buffered)
                + 2 * H * tn * in_b                 # w blocks
                + 2 * tm * tn * out_b               # out blocks
                + 2 * tn * 4)                       # f32 bias

    # M (sublane) tile: as large as possible (fewer W re-reads), multiple of 8.
    tm = min(2048, _round_up(M, 8))
    while tm > 8 and footprint(tm) > budget:
        tm = max(8, _round_up(tm // 2, 8))
    return tm, tn


def _select_ksplit_tiles(M, H, I, in_b, out_b, budget):
    tk = 512 if H % 128 == 0 else H
    tn = I if I % 128 != 0 else min(I, 512)

    def footprint(tm):
        return (2 * tm * tk * in_b + 2 * tk * tn * in_b
                + 2 * tm * tn * out_b + tm * tn * 4 + 2 * tn * 4)

    tm = min(1024, _round_up(M, 8))
    while tm > 8 and footprint(tm) > budget:
        tm = max(8, _round_up(tm // 2, 8))
    return tm, tn, tk


def bert_intermediate(x, w, b, *, act="gelu"):
    """out = act(x @ w + b).

    x: [..., H] activations (f32 or bf16; bf16 is the recommended storage dtype),
    w: [H, I] (nn.Linear weight, transposed), b: [I].  Returns [..., I] in x.dtype.
    """
    *lead, H = x.shape
    I = w.shape[1]
    x2 = x.reshape(-1, H)
    M = x2.shape[0]

    b_f32 = b.astype(jnp.float32).reshape(1, I)     # bias stays f32 end-to-end

    in_b = max(jnp.dtype(x.dtype).itemsize, jnp.dtype(w.dtype).itemsize)
    out_b = jnp.dtype(x.dtype).itemsize
    budget = _vmem_budget_bytes()

    # Can the whole K = H reduction be resident even for a minimal (8, 128) tile?
    lane_min = min(I, 128)
    min_collapsed = (2 * 8 * H * in_b + 2 * H * lane_min * in_b
                     + 2 * 8 * lane_min * out_b)
    collapse_k = min_collapsed <= budget            # always true for BERT H<=1024

    if collapse_k:
        tm, tn = _select_collapsed_tiles(M, H, I, in_b, out_b, budget)
        grid = (pl.cdiv(M, tm), pl.cdiv(I, tn))
        kernel = functools.partial(_fused_kernel, act=act)
        in_specs = [
            pl.BlockSpec((tm, H), lambda i, j: (i, 0)),   # activations strip
            pl.BlockSpec((H, tn), lambda i, j: (0, j)),   # weights (tn=I -> DMA'd once)
            pl.BlockSpec((1, tn), lambda i, j: (0, j)),   # f32 bias (lane-aligned)
        ]
        out_specs = pl.BlockSpec((tm, tn), lambda i, j: (i, j))
        scratch_shapes = []
        dims = ("parallel", "parallel")
    else:
        # TODO(synk): only reached for pathological hidden sizes; not tuned.
        tm, tn, tk = _select_ksplit_tiles(M, H, I, in_b, out_b, budget)
        grid = (pl.cdiv(M, tm), pl.cdiv(I, tn), pl.cdiv(H, tk))
        kernel = functools.partial(_ksplit_kernel, act=act)
        in_specs = [
            pl.BlockSpec((tm, tk), lambda i, j, k: (i, k)),
            pl.BlockSpec((tk, tn), lambda i, j, k: (k, j)),
            pl.BlockSpec((1, tn), lambda i, j, k: (0, j)),
        ]
        out_specs = pl.BlockSpec((tm, tn), lambda i, j, k: (i, j))
        scratch_shapes = [pltpu.VMEM((tm, tn), jnp.float32)]
        dims = ("parallel", "parallel", "arbitrary")

    out = pl.pallas_call(
        kernel,
        out_shape=jax.ShapeDtypeStruct((M, I), x.dtype),
        grid=grid,
        in_specs=in_specs,
        out_specs=out_specs,
        scratch_shapes=scratch_shapes,
        compiler_params=pltpu.CompilerParams(
            dimension_semantics=dims,
            vmem_limit_bytes=budget),
    )(x2, w, b_f32)

    return out.reshape(tuple(lead) + (I,))


if __name__ == "__main__":
    # Small shapes consistent with the module: batch=2, seq=8, hidden=32, intermediate=64.
    B, S, H, I = 2, 8, 32, 64

    key = jax.random.PRNGKey(0)
    kx, kw, kb = jax.random.split(key, 3)
    x = jax.random.normal(kx, (B, S, H), jnp.float32)
    w = 0.02 * jax.random.normal(kw, (H, I), jnp.float32)   # nn.Linear weight, stored (H, I)
    b = 0.01 * jax.random.normal(kb, (I,), jnp.float32)

    # Pure-JAX reference (exact-erf GELU, matches torch.nn.GELU() default).
    ref = jnp.dot(x, w) + b
    ref = 0.5 * ref * (1.0 + lax.erf(ref * _SQRT_HALF))

    # f32 path (matches PyTorch defaults numerically).
    out = bert_intermediate(x, w, b, act="gelu")
    jax.block_until_ready(out)
    assert out.shape == (B, S, I)
    assert jnp.all(jnp.isfinite(out))
    assert jnp.allclose(out, ref, atol=1e-5, rtol=1e-5), float(jnp.max(jnp.abs(out - ref)))

    # bf16 storage path (recommended production dtype, esp. on v5e); bias stays f32.
    out_bf16 = bert_intermediate(x.astype(jnp.bfloat16), w.astype(jnp.bfloat16), b,
                                 act="gelu")
    jax.block_until_ready(out_bf16)
    assert out_bf16.shape == (B, S, I)
    assert jnp.allclose(out_bf16.astype(jnp.float32), ref, atol=3e-2, rtol=3e-2)

    print("KERNEL_OK")
</pallas_src>

<mosaic_0001>
module attributes {stable_mosaic.version = 11 : i64} {
  func.func @_fused_kernel(%arg0: i32, %arg1: i32, %arg2: memref<16x32xf32, #tpu.memory_space<vmem>>, %arg3: memref<32x64xf32, #tpu.memory_space<vmem>>, %arg4: memref<1x64xf32, #tpu.memory_space<vmem>>, %arg5: memref<16x64xf32, #tpu.memory_space<vmem>>) attributes {dimension_semantics = [#tpu.dimension_semantics<parallel>, #tpu.dimension_semantics<parallel>], iteration_bounds = array<i64: 1, 1>, scalar_prefetch = 0 : i64, scratch_operands = 0 : i64, tpu.core_type = #tpu.core_type<tc>, window_params = [{transform_indices = @transform_0, window_bounds = array<i64: 16, 32>}, {transform_indices = @transform_1, window_bounds = array<i64: 32, 64>}, {transform_indices = @transform_2, window_bounds = array<i64: 1, 64>}, {transform_indices = @transform_3, window_bounds = array<i64: 16, 64>}]} {
    %c0 = arith.constant 0 : index
    %c0_0 = arith.constant 0 : index
    %0 = vector.load %arg2[%c0, %c0_0] : memref<16x32xf32, #tpu.memory_space<vmem>>, vector<16x32xf32>
    %c0_1 = arith.constant 0 : index
    %c0_2 = arith.constant 0 : index
    %1 = vector.load %arg3[%c0_1, %c0_2] : memref<32x64xf32, #tpu.memory_space<vmem>>, vector<32x64xf32>
    %cst = arith.constant dense<0.000000e+00> : vector<16x64xf32>
    %2 = tpu.matmul %0, %1, %cst {dimension_numbers = #tpu.dot_dimension_numbers<[1], [0], [0], [1], [0, 0, 1, 1], [], []>} : vector<16x32xf32>, vector<32x64xf32>, vector<16x64xf32> -> vector<16x64xf32>
    %c0_3 = arith.constant 0 : index
    %c0_4 = arith.constant 0 : index
    %3 = vector.load %arg4[%c0_3, %c0_4] : memref<1x64xf32, #tpu.memory_space<vmem>>, vector<1x64xf32>
    %4 = vector.broadcast %3 : vector<1x64xf32> to vector<16x64xf32>
    %5 = arith.addf %2, %4 : vector<16x64xf32>
    %cst_5 = arith.constant 5.000000e-01 : f32
    %6 = vector.broadcast %cst_5 : f32 to vector<16x64xf32>
    %7 = arith.mulf %6, %5 : vector<16x64xf32>
    %cst_6 = arith.constant 0.707106769 : f32
    %8 = vector.broadcast %cst_6 : f32 to vector<16x64xf32>
    %9 = arith.mulf %5, %8 : vector<16x64xf32>
    %10 = math.erf %9 : vector<16x64xf32>
    %cst_7 = arith.constant 1.000000e+00 : f32
    %11 = vector.broadcast %cst_7 : f32 to vector<16x64xf32>
    %12 = arith.addf %11, %10 : vector<16x64xf32>
    %13 = arith.mulf %7, %12 : vector<16x64xf32>
    %c0_8 = arith.constant 0 : index
    %c0_9 = arith.constant 0 : index
    %14 = vector.load %arg5[%c0_8, %c0_9] : memref<16x64xf32, #tpu.memory_space<vmem>>, vector<16x64xf32>
    tpu.vector_store %arg5[%c0_8, %c0_9], %13 {strides = array<i32>} : memref<16x64xf32, #tpu.memory_space<vmem>>, vector<16x64xf32>,
    return
  }
  func.func @transform_0(%arg0: i32, %arg1: i32) -> (i32, i32) {
    %c0_i32 = arith.constant 0 : i32
    %c0_i32_0 = arith.constant 0 : i32
    return %arg0, %c0_i32 : i32, i32
  }
  func.func @transform_1(%arg0: i32, %arg1: i32) -> (i32, i32) {
    %c0_i32 = arith.constant 0 : i32
    %c0_i32_0 = arith.constant 0 : i32
    return %c0_i32, %arg1 : i32, i32
  }
  func.func @transform_2(%arg0: i32, %arg1: i32) -> (i32, i32) {
    %c0_i32 = arith.constant 0 : i32
    %c0_i32_0 = arith.constant 0 : i32
    return %c0_i32, %arg1 : i32, i32
  }
  func.func @transform_3(%arg0: i32, %arg1: i32) -> (i32, i32) {
    %c0_i32 = arith.constant 0 : i32
    return %arg0, %arg1 : i32, i32
  }
}

</mosaic_0001>

<bundles_post_ra>
// kernel: tpu_custom_call.1
= control target key start
LH: loop header
LB: loop body
LE: loop exit
PB: predicated region body
PF: predicated region fallthrough
CT: control target
= control target key end

     0   :  { %8 = vsyncpa [#allocation3], 0  ;;  %s351_s0 = inlined_call_operand.hbm [shape: f32[16,32], index: 0, kind: input, shape index: {}]   ;;  %s352_s1 = inlined_call_operand.hbm [shape: f32[32,64], index: 1, kind: input, shape index: {}]   ;;  %s353_s2 = inlined_call_operand.vmem [shape: f32[1,64], index: 2, kind: input, shape index: {}]   ;;  %s354_s3 = inlined_call_operand.hbm [shape: f32[16,64], index: 3, kind: output, shape index: {}]  }
   0x1   :  { %9 = vsyncpa [#allocation6], 0 }
   0x2   :  { %10 = vsyncpa [#allocation4], 0  ;;  %s278_s12 = smov [#allocation2]   ;;  %s206_s16 = scalar_lea.hbm %s351_s0, 256 }
   0x3   :  { %s16_s13 = sshll.u32 %s278_s12, 4  ;;  %p207_p0 = scmp.ne.s32.totalorder %s351_s0, %s206_s16  ;;  %s17_s13 = int_to_ptr.vmem [resolvable:$true] %s16_s13 }
   0x4   :  { %p210_p1 = scmp.lt.u32.totalorder %s206_s16, %s351_s0 }
   0x6   :  { %p212_p2 = pnand %p210_p1, %p207_p0 }
   0x8   :  { %215 = shalt.err (!%p212_p2)
}
   0x9   :  { %s216_s21 = scalar_lea.vmem %s17_s13, 256  ;;  %p221_p4 = scmp.lt.s32.totalorder %s17_s13, %s17_s13 }
   0xa   :  { %p217_p3 = scmp.ne.s32.totalorder %s17_s13, %s216_s21  ;;  %p222_p5 = scmp.lt.s32.totalorder %s216_s21, %s216_s21 }
   0xc   :  { %p223_p6 = por %p222_p5, %p221_p4 }
   0xe   :  { %p224_p7 = pnand %p223_p6, %p217_p3 }
  0x10   :  { %227 = shalt.err (!%p224_p7)
}
  0x11   :  { %s279_s22 = smov 128   ;;  %s280_s23 = smov 8  }
  0x12   :  { %22 = dma.hbm_to_vmem [thread:$0]  %s351_s0, 256, %s17_s13, [#allocation3], %s279_s22, %s279_s22, %s280_s23  }
  0x13   :  { %s281_s26 = smov [#allocation5]   ;;  %s228_s30 = scalar_lea.hbm %s352_s1, 512 }
  0x14   :  { %s28_s27 = sshll.u32 %s281_s26, 4  ;;  %p229_p8 = scmp.ne.s32.totalorder %s352_s1, %s228_s30  ;;  %s29_s27 = int_to_ptr.vmem [resolvable:$true] %s28_s27 }
  0x15   :  { %p232_p9 = scmp.lt.u32.totalorder %s228_s30, %s352_s1 }
  0x17   :  { %p234_p10 = pnand %p232_p9, %p229_p8 }
  0x19   :  { %237 = shalt.err (!%p234_p10)
}
  0x1a   :  { %s238_s8 = scalar_lea.vmem %s29_s27, 512  ;;  %p243_p12 = scmp.lt.s32.totalorder %s29_s27, %s29_s27 }
  0x1b   :  { %p239_p11 = scmp.ne.s32.totalorder %s29_s27, %s238_s8  ;;  %p244_p13 = scmp.lt.s32.totalorder %s238_s8, %s238_s8 }
  0x1d   :  { %p245_p0 = por %p244_p13, %p243_p12 }
  0x1f   :  { %p246_p1 = pnand %p245_p0, %p239_p11 }
  0x21   :  { %249 = shalt.err (!%p246_p1)
}
  0x22   :  { %34 = dma.hbm_to_vmem [thread:$0]  %s352_s1, 512, %s29_s27, [#allocation6], %s279_s22, %s279_s22, %s280_s23  }
  0x23   :  { %272 = dma.done.wait [#allocation3], 256  }
  0x24   :  { %273 = vsyncadd [#allocation3], 4294967040 }
  0x25   :  { %274 = dma.done.wait [#allocation6], 512  }
  0x26   :  { %275 = vsyncadd [#allocation6], 4294966784  ;;  %vm56_vm0 = vcmask 261120   ;;  %v45_v0 = vld [vmem:[#allocation5] sm:$0xff]  ;;  %v46_v1 = vld [vmem:[#allocation5 + $0x8] sm:$0xff]  ;;  %s282_s11 = smov [#allocation7]  }
  0x27   :  { %v47_v2 = vld [vmem:[#allocation5 + $0x10] sm:$0xff]  ;;  %v189_v3 = vpack.c.bf16 %v46_v1, %v45_v0  ;;  %v48_v4 = vld [vmem:[#allocation5 + $0x18] sm:$0xff]  ;;  %s156_s12 = sshll.u32 %s282_s11, 4  ;;  %vm148_vm1 = vcmask 523264   ;;  %s157_s12 = int_to_ptr.vmem [resolvable:$true] %s156_s12 }
  0x28   :  { %v43_v5 = vld [vmem:[#allocation2] sm:$0xff]  ;;  %v193_v6 = vpack.c.bf16 %v48_v4, %v47_v2  ;;  %v44_v7 = vld [vmem:[#allocation2 + $0x8] sm:$0xff]  ;;  %p255_p3 = scmp.lt.s32.totalorder %s157_s12, %s157_s12 }
  0x29   :  { %186 = vmatprep.mubr.msk.f32.mxu0 %vm56_vm0, %v43_v5  ;;  %190 = vmatprep.subr.bf16.mxu0 %v189_v3  ;;  %v169_v8 = vld [vmem:[%s353_s2] ss:$0 sm:$0xff]  ;;  %s250_s2 = scalar_lea.vmem %s157_s12, 256 }
  0x2a   :  { %192 = vmatpush3.bf16.msra.mxu0 %v189_v3  ;;  %p251_p2 = scmp.ne.s32.totalorder %s157_s12, %s250_s2  ;;  %p256_p4 = scmp.lt.s32.totalorder %s250_s2, %s250_s2 }
  0x2b   :  { %194 = vmatprep.subr.bf16.mxu0 %v193_v6 }
  0x2c   :  { %p257_p5 = por %p256_p4, %p255_p3 }
  0x2e   :  { %196 = vmatpush3.bf16.msra.mxu0 %v193_v6  ;;  %p258_p6 = pnand %p257_p5, %p251_p2 }
  0x31   :  { %187 = vmatmul.mubr.msk.f32.vlgmr.msra.gmra.mrb[0].mxu0 %vm56_vm0, %v44_v7 }
 0x104   :  { %v188_v9 = vpop.f32.mrb[0].mxu0 }
 0x105   :  { %v135_v10 = vadd.f32 %v188_v9, %v169_v8  ;;  %v129_v11 = vpop.f32.mrb[1].mxu0 }
 0x106   :  { %v130_v12 = vadd.f32 %v169_v8, %v129_v11 }
 0x107   :  { %v141_v13 = vmul.f32 0.70710677, %v135_v10  ;;  %v139_v17 = vmul.f32 0.5, %v135_v10 }
 0x108   :  { %v140_v14 = vmul.f32 0.70710677, %v130_v12  ;;  %v138_v19 = vmul.f32 0.5, %v130_v12 }
 0x109   :  { %202 = verf.f32 %v141_v13 }
 0x10a   :  { %204 = verf.f32 %v140_v14 }
 0x113   :  { %v203_v15 = vpop.eup %202 }
 0x114   :  { %v205_v16 = vpop.eup %204  ;;  %v145_v18 = vadd.f32 1.0, %v203_v15 }
 0x115   :  { %v144_v20 = vadd.f32 1.0, %v205_v16 }
 0x116   :  { %v147_v21 = vmul.f32 %v145_v18, %v139_v17 }
 0x117   :  { %v146_v22 = vmul.f32 %v144_v20, %v138_v19 }
 0x118   :  { %150 = vst.msk [vmem:[#allocation7 + $0x8] sm:$0xff] %vm148_vm1, %v147_v21 }
 0x119   :  { %149 = vst.msk [vmem:[#allocation7] sm:$0xff] %vm148_vm1, %v146_v22 }
 0x11a   :  { %261 = shalt.err (!%p258_p6)
}
 0x11b   :  { %s262_s15 = scalar_lea.hbm %s354_s3, 256 }
 0x11c   :  { %p263_p7 = scmp.ne.s32.totalorder %s354_s3, %s262_s15  ;;  %p266_p8 = scmp.lt.u32.totalorder %s262_s15, %s354_s3 }
 0x11e   :  { %p268_p9 = pnand %p266_p8, %p263_p7 }
 0x120   :  { %271 = shalt.err (!%p268_p9)
}
 0x121   :  { %162 = dma.vmem_to_hbm [thread:$0]  %s157_s12, 256, %s354_s3, [#allocation4], %s279_s22, %s279_s22, %s280_s23  }
 0x122   :  { %276 = dma.done.wait [#allocation4], 256  }
 0x123   :  { %277 = vsyncadd [#allocation4], 4294967040 }
 0x124   :  { %166 = vsyncpa [#allocation3], 1 }
 0x125   :  { %167 = vsyncpa [#allocation6], 1 }
 0x126   :  { %168 = vsyncpa [#allocation4], 1 }

</bundles_post_ra>
